<compile_context>
chip_gen: v7x
topology: tpu7x:2x2x1
jax: 0.10.0
libtpu: 0.0.40
codegen_flags: <defaults>
</compile_context>

<pallas_src>
import functools

import jax
import jax.numpy as jnp
from jax.experimental import pallas as pl
from jax.experimental.pallas import tpu as pltpu


def _ffn_kernel(x_ref, w1_ref, b1_ref, w2_ref, b2_ref, o_ref, acc_ref):
    # x_ref:  (tm, C)    current row tile (constant across k -> not re-fetched)
    # w1_ref: (C, tk)    k-th column tile of W1
    # b1_ref: (1, tk)    k-th tile of b1
    # w2_ref: (tk, C)    k-th row tile of W2
    # b2_ref: (1, C)     full b2
    # o_ref:  (tm, C)    output row tile (resident across k)
    # acc_ref:(tm, C)    f32 accumulator scratch
    k = pl.program_id(1)

    @pl.when(k == 0)
    def _():
        # fold the second-layer bias into the accumulator init
        acc_ref[...] = jnp.broadcast_to(
            b2_ref[...].astype(jnp.float32), acc_ref.shape)

    # first matmul on the MXU (bf16 inputs, f32 accumulate), bias + ReLU on VPU
    h = jnp.dot(x_ref[...].astype(w1_ref.dtype), w1_ref[...],
                preferred_element_type=jnp.float32)
    h = jnp.maximum(h + b1_ref[...], 0.0)

    # partial second matmul, accumulated over hidden tiles
    acc_ref[...] += jnp.dot(h.astype(w2_ref.dtype), w2_ref[...],
                            preferred_element_type=jnp.float32)

    @pl.when(k == pl.num_programs(1) - 1)
    def _():
        o_ref[...] = acc_ref[...].astype(o_ref.dtype)


def _round_up(a, b):
    return ((a + b - 1) // b) * b


@functools.partial(jax.jit, static_argnames=("tm", "tk"))
def wml_feedforward(x, w1, b1, w2, b2, *, tm=256, tk=512):
    """x: (B, T, C). w1: (C, 4C), b1: (1, 4C), w2: (4C, C), b2: (1, C).

    Returns (B, T, C).  Dropout is identity (eval semantics).
    """
    B, T, C = x.shape
    H = w1.shape[1]
    M = B * T
    x2d = x.reshape(M, C)

    # clamp row tile to the (8-aligned) problem size; no host-side padding
    tm = max(8, min(tm, _round_up(M, 8)))
    # hidden tile must evenly divide H so every k-step is exact (no masking)
    tk = min(tk, H)
    if H % tk != 0:
        tk = H

    grid = (pl.cdiv(M, tm), H // tk)

    nbytes = lambda a: a.size * a.dtype.itemsize
    cost = pl.CostEstimate(
        flops=4 * M * C * H,                       # two (M,C,H) matmuls
        transcendentals=0,
        bytes_accessed=(nbytes(x2d) + nbytes(w1) + nbytes(b1)
                        + nbytes(w2) + nbytes(b2) + M * C * x.dtype.itemsize),
    )

    out = pl.pallas_call(
        _ffn_kernel,
        out_shape=jax.ShapeDtypeStruct((M, C), x.dtype),
        grid_spec=pltpu.PrefetchScalarGridSpec(
            num_scalar_prefetch=0,
            grid=grid,
            in_specs=[
                pl.BlockSpec((tm, C), lambda i, k: (i, 0)),   # x row tile
                pl.BlockSpec((C, tk), lambda i, k: (0, k)),   # W1 column tile
                pl.BlockSpec((1, tk), lambda i, k: (0, k)),   # b1 tile
                pl.BlockSpec((tk, C), lambda i, k: (k, 0)),   # W2 row tile
                pl.BlockSpec((1, C), lambda i, k: (0, 0)),    # b2 (full)
            ],
            out_specs=pl.BlockSpec((tm, C), lambda i, k: (i, 0)),
            scratch_shapes=[pltpu.VMEM((tm, C), jnp.float32)],
        ),
        compiler_params=pltpu.CompilerParams(
            dimension_semantics=("parallel", "arbitrary"),
            vmem_limit_bytes=48 * 1024 * 1024,
        ),
        cost_estimate=cost,
    )(x2d, w1, b1, w2, b2)

    return out.reshape(B, T, C)


def init_params(key, n_embd, weight_dtype=jnp.bfloat16):
    """Init matching nn.Linear shapes (weights stored transposed: (in, out)).

    Weights in bf16 (MXU-native), biases kept in f32.
    """
    k1, k2, k3, k4 = jax.random.split(key, 4)
    hidden = 4 * n_embd
    # PyTorch Linear default: U(-1/sqrt(in), 1/sqrt(in))
    lim1 = 1.0 / jnp.sqrt(jnp.float32(n_embd))
    lim2 = 1.0 / jnp.sqrt(jnp.float32(hidden))
    w1 = jax.random.uniform(k1, (n_embd, hidden), jnp.float32, -lim1, lim1)
    b1 = jax.random.uniform(k2, (1, hidden), jnp.float32, -lim1, lim1)
    w2 = jax.random.uniform(k3, (hidden, n_embd), jnp.float32, -lim2, lim2)
    b2 = jax.random.uniform(k4, (1, n_embd), jnp.float32, -lim2, lim2)
    return w1.astype(weight_dtype), b1, w2.astype(weight_dtype), b2


if __name__ == "__main__":
    key = jax.random.PRNGKey(0)
    # lane-dense feature dim (multiple of 128) -> hidden = 512
    n_embd = 128
    B, T = 2, 8

    kx, kp = jax.random.split(key)
    x = jax.random.normal(kx, (B, T, n_embd), jnp.float32)
    w1, b1, w2, b2 = init_params(kp, n_embd)

    y = wml_feedforward(x, w1, b1, w2, b2)
    y = jax.block_until_ready(y)

    # reference in plain JAX, mirroring the kernel's bf16-input / f32-accumulate path
    # (eval-mode dropout == identity)
    xb = x.reshape(-1, n_embd).astype(jnp.bfloat16).astype(jnp.float32)
    w1f = w1.astype(jnp.float32)
    w2f = w2.astype(jnp.float32)
    h = jnp.maximum(xb @ w1f + b1, 0.0)
    hb = h.astype(jnp.bfloat16).astype(jnp.float32)
    ref = (hb @ w2f + b2).reshape(B, T, n_embd)

    assert y.shape == (B, T, n_embd)
    assert jnp.allclose(y, ref, atol=2e-2, rtol=2e-2), (
        float(jnp.max(jnp.abs(y - ref))))

    print("KERNEL_OK")
</pallas_src>

<mosaic_0001>
module attributes {stable_mosaic.version = 11 : i64} {
  func.func @_ffn_kernel(%arg0: i32, %arg1: i32, %arg2: memref<16x128xf32, #tpu.memory_space<vmem>>, %arg3: memref<128x512xbf16, #tpu.memory_space<vmem>>, %arg4: memref<1x512xf32, #tpu.memory_space<vmem>>, %arg5: memref<512x128xbf16, #tpu.memory_space<vmem>>, %arg6: memref<1x128xf32, #tpu.memory_space<vmem>>, %arg7: memref<16x128xf32, #tpu.memory_space<vmem>>, %arg8: memref<16x128xf32, #tpu.memory_space<vmem>>) attributes {dimension_semantics = [#tpu.dimension_semantics<parallel>, #tpu.dimension_semantics<arbitrary>], iteration_bounds = array<i64: 1, 1>, scalar_prefetch = 0 : i64, scratch_operands = 1 : i64, tpu.core_type = #tpu.core_type<tc>, window_params = [{transform_indices = @transform_0, window_bounds = array<i64: 16, 128>}, {transform_indices = @transform_1, window_bounds = array<i64: 128, 512>}, {transform_indices = @transform_2, window_bounds = array<i64: 1, 512>}, {transform_indices = @transform_3, window_bounds = array<i64: 512, 128>}, {pipeline_mode = #tpu.pipeline_mode<synchronous>, transform_indices = @transform_4, window_bounds = array<i64: 1, 128>}, {transform_indices = @transform_5, window_bounds = array<i64: 16, 128>}]} {
    %c0_i32 = arith.constant 0 : i32
    %0 = arith.cmpi eq, %arg1, %c0_i32 : i32
    %1 = arith.extui %0 : i1 to i32
    %c0_i32_0 = arith.constant 0 : i32
    %2 = arith.cmpi ne, %1, %c0_i32_0 : i32
    scf.if %2 {
      %c0_16 = arith.constant 0 : index
      %c0_17 = arith.constant 0 : index
      %21 = vector.load %arg6[%c0_16, %c0_17] : memref<1x128xf32, #tpu.memory_space<vmem>>, vector<1x128xf32>
      %22 = vector.shape_cast %21 : vector<1x128xf32> to vector<1x128xf32>
      %23 = vector.broadcast %22 : vector<1x128xf32> to vector<16x128xf32>
      %c0_18 = arith.constant 0 : index
      %c0_19 = arith.constant 0 : index
      %24 = vector.load %arg8[%c0_18, %c0_19] : memref<16x128xf32, #tpu.memory_space<vmem>>, vector<16x128xf32>
      tpu.vector_store %arg8[%c0_18, %c0_19], %23 {strides = array<i32>} : memref<16x128xf32, #tpu.memory_space<vmem>>, vector<16x128xf32>,
    } else {
    }
    %c0 = arith.constant 0 : index
    %c0_1 = arith.constant 0 : index
    %3 = vector.load %arg2[%c0, %c0_1] : memref<16x128xf32, #tpu.memory_space<vmem>>, vector<16x128xf32>
    %4 = arith.truncf %3 : vector<16x128xf32> to vector<16x128xbf16>
    %c0_2 = arith.constant 0 : index
    %c0_3 = arith.constant 0 : index
    %5 = vector.load %arg3[%c0_2, %c0_3] : memref<128x512xbf16, #tpu.memory_space<vmem>>, vector<128x512xbf16>
    %cst = arith.constant dense<0.000000e+00> : vector<16x512xf32>
    %6 = tpu.matmul %4, %5, %cst {dimension_numbers = #tpu.dot_dimension_numbers<[1], [0], [0], [1], [0, 0, 1, 1], [], []>} : vector<16x128xbf16>, vector<128x512xbf16>, vector<16x512xf32> -> vector<16x512xf32>
    %c0_4 = arith.constant 0 : index
    %c0_5 = arith.constant 0 : index
    %7 = vector.load %arg4[%c0_4, %c0_5] : memref<1x512xf32, #tpu.memory_space<vmem>>, vector<1x512xf32>
    %8 = vector.broadcast %7 : vector<1x512xf32> to vector<16x512xf32>
    %9 = arith.addf %6, %8 : vector<16x512xf32>
    %cst_6 = arith.constant 0.000000e+00 : f32
    %10 = vector.broadcast %cst_6 : f32 to vector<16x512xf32>
    %11 = arith.maximumf %9, %10 : vector<16x512xf32>
    %c0_7 = arith.constant 0 : index
    %c0_8 = arith.constant 0 : index
    %12 = vector.load %arg8[%c0_7, %c0_8] : memref<16x128xf32, #tpu.memory_space<vmem>>, vector<16x128xf32>
    %13 = arith.truncf %11 : vector<16x512xf32> to vector<16x512xbf16>
    %c0_9 = arith.constant 0 : index
    %c0_10 = arith.constant 0 : index
    %14 = vector.load %arg5[%c0_9, %c0_10] : memref<512x128xbf16, #tpu.memory_space<vmem>>, vector<512x128xbf16>
    %cst_11 = arith.constant dense<0.000000e+00> : vector<16x128xf32>
    %15 = tpu.matmul %13, %14, %cst_11 {dimension_numbers = #tpu.dot_dimension_numbers<[1], [0], [0], [1], [0, 0, 1, 1], [], []>} : vector<16x512xbf16>, vector<512x128xbf16>, vector<16x128xf32> -> vector<16x128xf32>
    %16 = arith.addf %12, %15 : vector<16x128xf32>
    %c0_12 = arith.constant 0 : index
    %c0_13 = arith.constant 0 : index
    %17 = vector.load %arg8[%c0_12, %c0_13] : memref<16x128xf32, #tpu.memory_space<vmem>>, vector<16x128xf32>
    tpu.vector_store %arg8[%c0_12, %c0_13], %16 {strides = array<i32>} : memref<16x128xf32, #tpu.memory_space<vmem>>, vector<16x128xf32>,
    %c0_i32_14 = arith.constant 0 : i32
    %18 = arith.cmpi eq, %arg1, %c0_i32_14 : i32
    %19 = arith.extui %18 : i1 to i32
    %c0_i32_15 = arith.constant 0 : i32
    %20 = arith.cmpi ne, %19, %c0_i32_15 : i32
    scf.if %20 {
      %c0_16 = arith.constant 0 : index
      %c0_17 = arith.constant 0 : index
      %21 = vector.load %arg8[%c0_16, %c0_17] : memref<16x128xf32, #tpu.memory_space<vmem>>, vector<16x128xf32>
      %c0_18 = arith.constant 0 : index
      %c0_19 = arith.constant 0 : index
      %22 = vector.load %arg7[%c0_18, %c0_19] : memref<16x128xf32, #tpu.memory_space<vmem>>, vector<16x128xf32>
      tpu.vector_store %arg7[%c0_18, %c0_19], %21 {strides = array<i32>} : memref<16x128xf32, #tpu.memory_space<vmem>>, vector<16x128xf32>,
    } else {
    }
    return
  }
  func.func @transform_0(%arg0: i32, %arg1: i32) -> (i32, i32) {
    %c0_i32 = arith.constant 0 : i32
    %c0_i32_0 = arith.constant 0 : i32
    return %arg0, %c0_i32 : i32, i32
  }
  func.func @transform_1(%arg0: i32, %arg1: i32) -> (i32, i32) {
    %c0_i32 = arith.constant 0 : i32
    %c0_i32_0 = arith.constant 0 : i32
    return %c0_i32, %arg1 : i32, i32
  }
  func.func @transform_2(%arg0: i32, %arg1: i32) -> (i32, i32) {
    %c0_i32 = arith.constant 0 : i32
    %c0_i32_0 = arith.constant 0 : i32
    return %c0_i32, %arg1 : i32, i32
  }
  func.func @transform_3(%arg0: i32, %arg1: i32) -> (i32, i32) {
    %c0_i32 = arith.constant 0 : i32
    %c0_i32_0 = arith.constant 0 : i32
    return %arg1, %c0_i32 : i32, i32
  }
  func.func @transform_4(%arg0: i32, %arg1: i32) -> (i32, i32) {
    %c0_i32 = arith.constant 0 : i32
    %c0_i32_0 = arith.constant 0 : i32
    %c0_i32_1 = arith.constant 0 : i32
    return %c0_i32, %c0_i32_0 : i32, i32
  }
  func.func @transform_5(%arg0: i32, %arg1: i32) -> (i32, i32) {
    %c0_i32 = arith.constant 0 : i32
    %c0_i32_0 = arith.constant 0 : i32
    return %arg0, %c0_i32 : i32, i32
  }
}

</mosaic_0001>

<bundles_post_ra>
// kernel: wml_feedforward.1
= control target key start
LH: loop header
LB: loop body
LE: loop exit
PB: predicated region body
PF: predicated region fallthrough
CT: control target
= control target key end

     0   :  { %10 = vsyncpa [#allocation4], 0  ;;  %s1155_s0 = inlined_call_operand.hbm [shape: f32[16,128], index: 0, kind: input, shape index: {}]   ;;  %s1156_s1 = inlined_call_operand.hbm [shape: bf16[128,512], index: 1, kind: input, shape index: {}]   ;;  %s1157_s2 = inlined_call_operand.vmem [shape: f32[1,512], index: 2, kind: input, shape index: {}]   ;;  %s1158_s3 = inlined_call_operand.hbm [shape: bf16[512,128], index: 3, kind: input, shape index: {}]   ;;  %s1159_s4 = inlined_call_operand.vmem [shape: f32[1,128], index: 4, kind: input, shape index: {}]   ;;  %s1160_s5 = inlined_call_operand.hbm [shape: f32[16,128], index: 5, kind: output, shape index: {}]  }
   0x1   :  { %11 = vsyncpa [#allocation7], 0 }
   0x2   :  { %12 = vsyncpa [#allocation5], 0  ;;  %s1054_s18 = smov [#allocation6]   ;;  %s960_s22 = scalar_lea.hbm %s1156_s1, 4096 }
   0x3   :  { %s30_s19 = sshll.u32 %s1054_s18, 4  ;;  %p961_p0 = scmp.ne.s32.totalorder %s1156_s1, %s960_s22  ;;  %s31_s19 = int_to_ptr.vmem [resolvable:$true] %s30_s19 }
   0x4   :  { %p964_p1 = scmp.lt.u32.totalorder %s960_s22, %s1156_s1 }
   0x6   :  { %p966_p2 = pnand %p964_p1, %p961_p0 }
   0x8   :  { %969 = shalt.err (!%p966_p2)
}
   0x9   :  { %s970_s27 = scalar_lea.vmem %s31_s19, 4096  ;;  %p975_p4 = scmp.lt.s32.totalorder %s31_s19, %s31_s19 }
   0xa   :  { %p971_p3 = scmp.ne.s32.totalorder %s31_s19, %s970_s27  ;;  %p976_p5 = scmp.lt.s32.totalorder %s970_s27, %s970_s27 }
   0xc   :  { %p977_p6 = por %p976_p5, %p975_p4 }
   0xe   :  { %p978_p7 = pnand %p977_p6, %p971_p3 }
  0x10   :  { %981 = shalt.err (!%p978_p7)
}
  0x11   :  { %s1055_s28 = smov 256   ;;  %s1056_s29 = smov 16  }
  0x12   :  { %36 = dma.hbm_to_vmem [thread:$0]  %s1156_s1, 4096, %s31_s19, [#allocation7], %s1055_s28, %s1055_s28, %s1056_s29  }
  0x13   :  { %s1057_s7 = smov [#allocation3]   ;;  %s982_s11 = scalar_lea.hbm %s1155_s0, 256 }
  0x14   :  { %s18_s8 = sshll.u32 %s1057_s7, 4  ;;  %p983_p8 = scmp.ne.s32.totalorder %s1155_s0, %s982_s11  ;;  %s19_s8 = int_to_ptr.vmem [resolvable:$true] %s18_s8 }
  0x15   :  { %p986_p9 = scmp.lt.u32.totalorder %s982_s11, %s1155_s0 }
  0x17   :  { %p988_p10 = pnand %p986_p9, %p983_p8 }
  0x19   :  { %991 = shalt.err (!%p988_p10)
}
  0x1a   :  { %s992_s16 = scalar_lea.vmem %s19_s8, 256  ;;  %p997_p12 = scmp.lt.s32.totalorder %s19_s8, %s19_s8 }
  0x1b   :  { %p993_p11 = scmp.ne.s32.totalorder %s19_s8, %s992_s16  ;;  %p998_p13 = scmp.lt.s32.totalorder %s992_s16, %s992_s16 }
  0x1d   :  { %p999_p0 = por %p998_p13, %p997_p12 }
  0x1f   :  { %p1000_p1 = pnand %p999_p0, %p993_p11 }
  0x21   :  { %1003 = shalt.err (!%p1000_p1)
}
  0x22   :  { %s1058_s1 = smov 128   ;;  %s1059_s17 = smov 8  }
  0x23   :  { %24 = dma.hbm_to_vmem [thread:$0]  %s1155_s0, 256, %s19_s8, [#allocation4], %s1058_s1, %s1058_s1, %s1059_s17  }
  0x24   :  { %s1060_s20 = smov [#allocation8]   ;;  %s1004_s24 = scalar_lea.hbm %s1158_s3, 4096 }
  0x25   :  { %s44_s21 = sshll.u32 %s1060_s20, 4  ;;  %p1005_p2 = scmp.ne.s32.totalorder %s1158_s3, %s1004_s24  ;;  %s45_s21 = int_to_ptr.vmem [resolvable:$true] %s44_s21 }
  0x26   :  { %p1008_p3 = scmp.lt.u32.totalorder %s1004_s24, %s1158_s3 }
  0x28   :  { %p1010_p4 = pnand %p1008_p3, %p1005_p2 }
  0x2a   :  { %1013 = shalt.err (!%p1010_p4)
}
  0x2b   :  { %s1014_s29 = scalar_lea.vmem %s45_s21, 4096  ;;  %p1019_p6 = scmp.lt.s32.totalorder %s45_s21, %s45_s21 }
  0x2c   :  { %p1015_p5 = scmp.ne.s32.totalorder %s45_s21, %s1014_s29  ;;  %p1020_p7 = scmp.lt.s32.totalorder %s1014_s29, %s1014_s29 }
  0x2e   :  { %p1021_p8 = por %p1020_p7, %p1019_p6 }
  0x30   :  { %p1022_p9 = pnand %p1021_p8, %p1015_p5 }
  0x32   :  { %1025 = shalt.err (!%p1022_p9)
}
  0x33   :  { %s1061_s0 = smov 64   ;;  %s1062_s30 = smov 4  }
  0x34   :  { %50 = dma.hbm_to_vmem [thread:$0]  %s1158_s3, 4096, %s45_s21, [#allocation7], %s1061_s0, %s1061_s0, %s1062_s30  }
  0x35   :  { %1048 = dma.done.wait [#allocation4], 256  }
  0x36   :  { %1049 = vsyncadd [#allocation4], 4294967040 }
  0x37   :  { %1050 = dma.done.wait [#allocation7], 8192  }
  0x38   :  { %1051 = vsyncadd [#allocation7], 4294959104  ;;  %v1063_v0 = vmov 0   ;;  %v880_v1 = vld [vmem:[#allocation6 + $0x4] ss:$16 sps:$4 sm:$0xff]   ;;  %v77_v34 = vld [vmem:[#allocation3 + $0x8] sm:$0xff] }
  0x39   :  { %325 = vmatprep.mubr.bf16.mxu0 %v1063_v0  ;;  %368 = vmatprep.mubr.bf16.mxu1 %v1063_v0  ;;  %v882_v2 = vld [vmem:[#allocation6 + $0xc] ss:$16 sps:$4 sm:$0xff]   ;;  %v884_v3 = vld [vmem:[#allocation6] ss:$16 sps:$4 sm:$0xff]   ;;  %v885_v4 = vld [vmem:[#allocation6 + $0x8] ss:$16 sps:$4 sm:$0xff]  }
  0x3a   :  { %293 = vmatprep.subr.bf16.mxu0 %v880_v1  ;;  %336 = vmatprep.subr.bf16.mxu1 %v882_v2  ;;  %v886_v5 = vld [vmem:[#allocation6 + $0x24] ss:$16 sps:$4 sm:$0xff]   ;;  %v888_v6 = vld [vmem:[#allocation6 + $0x2c] ss:$16 sps:$4 sm:$0xff]   ;;  %v890_v7 = vld [vmem:[#allocation6 + $0x20] ss:$16 sps:$4 sm:$0xff]  }
  0x3b   :  { %294 = vmatpush1.bf16.msra.mxu0 %v884_v3  ;;  %337 = vmatpush1.bf16.msra.mxu1 %v885_v4  ;;  %v891_v8 = vld [vmem:[#allocation6 + $0x28] ss:$16 sps:$4 sm:$0xff]   ;;  %v892_v9 = vld [vmem:[#allocation6 + $0x44] ss:$16 sps:$4 sm:$0xff]   ;;  %v894_v10 = vld [vmem:[#allocation6 + $0x4c] ss:$16 sps:$4 sm:$0xff]   ;;  %v113_v4 = vlaneseq }
  0x3c   :  { %295 = vmatprep.subr.bf16.mxu0 %v886_v5  ;;  %338 = vmatprep.subr.bf16.mxu1 %v888_v6  ;;  %v896_v11 = vld [vmem:[#allocation6 + $0x40] ss:$16 sps:$4 sm:$0xff]   ;;  %v897_v12 = vld [vmem:[#allocation6 + $0x48] ss:$16 sps:$4 sm:$0xff]   ;;  %v898_v13 = vld [vmem:[#allocation6 + $0x64] ss:$16 sps:$4 sm:$0xff]  }
  0x3d   :  { %v900_v14 = vld [vmem:[#allocation6 + $0x6c] ss:$16 sps:$4 sm:$0xff]   ;;  %v902_v15 = vld [vmem:[#allocation6 + $0x60] ss:$16 sps:$4 sm:$0xff]   ;;  %v903_v16 = vld [vmem:[#allocation6 + $0x68] ss:$16 sps:$4 sm:$0xff]  }
  0x3e   :  { %v904_v17 = vld [vmem:[#allocation6 + $0x84] ss:$16 sps:$4 sm:$0xff]   ;;  %v906_v18 = vld [vmem:[#allocation6 + $0x8c] ss:$16 sps:$4 sm:$0xff]   ;;  %v908_v19 = vld [vmem:[#allocation6 + $0x80] ss:$16 sps:$4 sm:$0xff]  }
  0x3f   :  { %296 = vmatpush1.bf16.msra.mxu0 %v890_v7  ;;  %339 = vmatpush1.bf16.msra.mxu1 %v891_v8  ;;  %v909_v20 = vld [vmem:[#allocation6 + $0x88] ss:$16 sps:$4 sm:$0xff]   ;;  %v910_v21 = vld [vmem:[#allocation6 + $0xa4] ss:$16 sps:$4 sm:$0xff]   ;;  %v912_v22 = vld [vmem:[#allocation6 + $0xac] ss:$16 sps:$4 sm:$0xff]  }
  0x40   :  { %297 = vmatprep.subr.bf16.mxu0 %v892_v9  ;;  %340 = vmatprep.subr.bf16.mxu1 %v894_v10  ;;  %v914_v23 = vld [vmem:[#allocation6 + $0xa0] ss:$16 sps:$4 sm:$0xff]   ;;  %v915_v24 = vld [vmem:[#allocation6 + $0xa8] ss:$16 sps:$4 sm:$0xff]   ;;  %v916_v25 = vld [vmem:[#allocation6 + $0xc4] ss:$16 sps:$4 sm:$0xff]  }
  0x41   :  { %v918_v26 = vld [vmem:[#allocation6 + $0xcc] ss:$16 sps:$4 sm:$0xff]   ;;  %v920_v27 = vld [vmem:[#allocation6 + $0xc0] ss:$16 sps:$4 sm:$0xff]   ;;  %v921_v28 = vld [vmem:[#allocation6 + $0xc8] ss:$16 sps:$4 sm:$0xff]  }
  0x42   :  { %v922_v29 = vld [vmem:[#allocation6 + $0xe4] ss:$16 sps:$4 sm:$0xff]   ;;  %v924_v30 = vld [vmem:[#allocation6 + $0xec] ss:$16 sps:$4 sm:$0xff]   ;;  %v926_v31 = vld [vmem:[#allocation6 + $0xe0] ss:$16 sps:$4 sm:$0xff]  }
  0x43   :  { %298 = vmatpush1.bf16.msra.mxu0 %v896_v11  ;;  %341 = vmatpush1.bf16.msra.mxu1 %v897_v12  ;;  %v927_v32 = vld [vmem:[#allocation6 + $0xe8] ss:$16 sps:$4 sm:$0xff]   ;;  %v76_v33 = vld [vmem:[#allocation3] sm:$0xff]  ;;  %v928_v35 = vld [vmem:[#allocation8 + $0x40] sm:$0xff]   ;;  %v114_v5 = vshrl.u32 %v113_v4, 7  ;;  %s1064_s10 = smov [#allocation9]  }
  0x44   :  { %299 = vmatprep.subr.bf16.mxu0 %v898_v13  ;;  %342 = vmatprep.subr.bf16.mxu1 %v900_v14  ;;  %v929_v36 = vld [vmem:[#allocation8 + $0xc0] sm:$0xff]   ;;  %v78_v38 = vpack.c.bf16 %v77_v34, %v76_v33  ;;  %v932_v40 = vld [vmem:[#allocation8 + $0x48] sm:$0xff]   ;;  %v936_v44 = vld [vmem:[#allocation8 + $0x50] sm:$0xff]   ;;  %s747_s11 = sshll.u32 %s1064_s10, 4  ;;  %s748_s11 = int_to_ptr.vmem [resolvable:$true] %s747_s11 }
  0x45   :  { %v930_v37 = vld [vmem:[#allocation8] sm:$0xff]   ;;  %v933_v41 = vld [vmem:[#allocation8 + $0xc8] sm:$0xff]   ;;  %v937_v45 = vld [vmem:[#allocation8 + $0xd0] sm:$0xff]   ;;  %v115_v6 = vsub.s32 0, %v114_v5  ;;  %v123_v7 = vsub.s32 2, %v114_v5  ;;  %v119_v9 = vsub.s32 1, %v114_v5  ;;  %p1031_p11 = scmp.lt.s32.totalorder %s748_s11, %s748_s11 }
  0x46   :  { %v931_v39 = vld [vmem:[#allocation8 + $0x80] sm:$0xff]   ;;  %v934_v42 = vld [vmem:[#allocation8 + $0x8] sm:$0xff]   ;;  %v938_v46 = vld [vmem:[#allocation8 + $0x10] sm:$0xff]   ;;  %v127_v10 = vsub.s32 3, %v114_v5  ;;  %s1026_s12 = scalar_lea.vmem %s748_s11, 256 }
  0x47   :  { %300 = vmatpush1.bf16.msra.mxu0 %v902_v15  ;;  %343 = vmatpush1.bf16.msra.mxu1 %v903_v16  ;;  %v935_v43 = vld [vmem:[#allocation8 + $0x88] sm:$0xff]   ;;  %v939_v47 = vld [vmem:[#allocation8 + $0x90] sm:$0xff]   ;;  %v940_v48 = vld [vmem:[#allocation8 + $0x58] sm:$0xff]   ;;  %p1027_p10 = scmp.ne.s32.totalorder %s748_s11, %s1026_s12  ;;  %p1032_p12 = scmp.lt.s32.totalorder %s1026_s12, %s1026_s12 }
  0x48   :  { %301 = vmatprep.subr.bf16.mxu0 %v904_v17  ;;  %344 = vmatprep.subr.bf16.mxu1 %v906_v18  ;;  %v941_v49 = vld [vmem:[#allocation8 + $0xd8] sm:$0xff]   ;;  %v944_v52 = vld [vmem:[#allocation8 + $0x60] sm:$0xff]   ;;  %v948_v56 = vld [vmem:[#allocation8 + $0x68] sm:$0xff]  }
  0x49   :  { %v942_v50 = vld [vmem:[#allocation8 + $0x18] sm:$0xff]   ;;  %v945_v53 = vld [vmem:[#allocation8 + $0xe0] sm:$0xff]   ;;  %v949_v57 = vld [vmem:[#allocation8 + $0xe8] sm:$0xff]   ;;  %p1033_p13 = por %p1032_p12, %p1031_p11 }
  0x4a   :  { %v943_v51 = vld [vmem:[#allocation8 + $0x98] sm:$0xff]   ;;  %v946_v54 = vld [vmem:[#allocation8 + $0x20] sm:$0xff]   ;;  %v950_v58 = vld [vmem:[#allocation8 + $0x28] sm:$0xff]  }
  0x4b   :  { %302 = vmatpush1.bf16.msra.mxu0 %v908_v19  ;;  %345 = vmatpush1.bf16.msra.mxu1 %v909_v20  ;;  %v947_v55 = vld [vmem:[#allocation8 + $0xa0] sm:$0xff]   ;;  %v951_v59 = vld [vmem:[#allocation8 + $0xa8] sm:$0xff]   ;;  %v952_v60 = vld [vmem:[#allocation8 + $0x70] sm:$0xff]   ;;  %p1034_p0 = pnand %p1033_p13, %p1027_p10 }
  0x4c   :  { %303 = vmatprep.subr.bf16.mxu0 %v910_v21  ;;  %346 = vmatprep.subr.bf16.mxu1 %v912_v22  ;;  %v953_v61 = vld [vmem:[#allocation8 + $0xf0] sm:$0xff]   ;;  %v956_v0 = vld [vmem:[#allocation8 + $0x78] sm:$0xff]  }
  0x4d   :  { %v954_v62 = vld [vmem:[#allocation8 + $0x30] sm:$0xff]   ;;  %v957_v1 = vld [vmem:[#allocation8 + $0xf8] sm:$0xff]  }
  0x4e   :  { %v955_v63 = vld [vmem:[#allocation8 + $0xb0] sm:$0xff]   ;;  %v958_v2 = vld [vmem:[#allocation8 + $0x38] sm:$0xff]  }
  0x4f   :  { %304 = vmatpush1.bf16.msra.mxu0 %v914_v23  ;;  %347 = vmatpush1.bf16.msra.mxu1 %v915_v24  ;;  %v959_v3 = vld [vmem:[#allocation8 + $0xb8] sm:$0xff]   ;;  %v111_v8 = vld [vmem:[%s1157_s2] sm:$0xf] }
  0x50   :  { %305 = vmatprep.subr.bf16.mxu0 %v916_v25  ;;  %348 = vmatprep.subr.bf16.mxu1 %v918_v26  ;;  %v116_v11 = vrot.slane %v111_v8, %v115_v6  ;;  %v124_v12 = vrot.slane %v111_v8, %v123_v7  ;;  %v120_v13 = vrot.slane %v111_v8, %v119_v9 }
  0x51   :  { %v128_v14 = vrot.slane %v111_v8, %v127_v10 }
  0x53   :  { %306 = vmatpush1.bf16.msra.mxu0 %v920_v27  ;;  %349 = vmatpush1.bf16.msra.mxu1 %v921_v28 }
  0x54   :  { %307 = vmatprep.subr.bf16.mxu0 %v922_v29  ;;  %350 = vmatprep.subr.bf16.mxu1 %v924_v30 }
  0x57   :  { %308 = vmatpush1.bf16.msra.mxu0 %v926_v31  ;;  %351 = vmatpush1.bf16.msra.mxu1 %v927_v32 }
  0x58   :  { %825 = vmatprep.subr.bf16.mxu0 %v928_v35  ;;  %847 = vmatprep.subr.bf16.mxu1 %v929_v36 }
  0x5a   :  { %326 = vmatmul.mubr.bf16.vlgmr.msra.gmra.mrb[0].mxu0 %v78_v38  ;;  %369 = vmatmul.mubr.bf16.vlgmr.msra.gmra.mrb[0].mxu1 %v78_v38 }
  0x5b   :  { %826 = vmatpush3.bf16.msra.mxu0 %v930_v37  ;;  %848 = vmatpush3.bf16.msra.mxu1 %v931_v39 }
  0x5c   :  { %827 = vmatprep.subr.bf16.mxu0 %v932_v40  ;;  %849 = vmatprep.subr.bf16.mxu1 %v933_v41 }
  0x5f   :  { %828 = vmatpush3.bf16.msra.mxu0 %v934_v42  ;;  %850 = vmatpush3.bf16.msra.mxu1 %v935_v43 }
  0x60   :  { %829 = vmatprep.subr.bf16.mxu0 %v936_v44  ;;  %851 = vmatprep.subr.bf16.mxu1 %v937_v45 }
  0x63   :  { %830 = vmatpush3.bf16.msra.mxu0 %v938_v46  ;;  %852 = vmatpush3.bf16.msra.mxu1 %v939_v47 }
  0x64   :  { %831 = vmatprep.subr.bf16.mxu0 %v940_v48  ;;  %853 = vmatprep.subr.bf16.mxu1 %v941_v49 }
  0x67   :  { %832 = vmatpush3.bf16.msra.mxu0 %v942_v50  ;;  %854 = vmatpush3.bf16.msra.mxu1 %v943_v51  ;;  %v760_v51 = vld [vmem:[%s1159_s4] ss:$0 sm:$0xff] }
  0x68   :  { %833 = vmatprep.subr.bf16.mxu0 %v944_v52  ;;  %855 = vmatprep.subr.bf16.mxu1 %v945_v53 }
  0x6b   :  { %834 = vmatpush3.bf16.msra.mxu0 %v946_v54  ;;  %856 = vmatpush3.bf16.msra.mxu1 %v947_v55 }
  0x6c   :  { %835 = vmatprep.subr.bf16.mxu0 %v948_v56  ;;  %857 = vmatprep.subr.bf16.mxu1 %v949_v57 }
  0x6f   :  { %836 = vmatpush3.bf16.msra.mxu0 %v950_v58  ;;  %858 = vmatpush3.bf16.msra.mxu1 %v951_v59 }
  0x70   :  { %837 = vmatprep.subr.bf16.mxu0 %v952_v60  ;;  %859 = vmatprep.subr.bf16.mxu1 %v953_v61 }
  0x73   :  { %838 = vmatpush3.bf16.msra.mxu0 %v954_v62  ;;  %860 = vmatpush3.bf16.msra.mxu1 %v955_v63 }
  0x74   :  { %839 = vmatprep.subr.bf16.mxu0 %v956_v0  ;;  %861 = vmatprep.subr.bf16.mxu1 %v957_v1 }
  0x77   :  { %840 = vmatpush3.bf16.msra.mxu0 %v958_v2  ;;  %862 = vmatpush3.bf16.msra.mxu1 %v959_v3 }
 0x12d   :  { %v327_v15 = vpop.f32.mrb[0].mxu0  ;;  %v370_v16 = vpop.f32.mrb[0].mxu1 }
 0x12e   :  { %v328_v17 = vadd.f32 %v327_v15, %v116_v11  ;;  %v371_v18 = vadd.f32 %v370_v16, %v124_v12  ;;  %v329_v19 = vpop.f32.mrb[1].mxu0  ;;  %v372_v20 = vpop.f32.mrb[1].mxu1 }
 0x12f   :  { %v330_v21 = vadd.f32 %v329_v19, %v120_v13  ;;  %v373_v22 = vadd.f32 %v372_v20, %v128_v14  ;;  %v331_v23 = vpop.f32.mrb[2].mxu0  ;;  %v374_v24 = vpop.f32.mrb[2].mxu1 }
 0x130   :  { %v332_v25 = vadd.f32 %v331_v23, %v116_v11  ;;  %v375_v26 = vadd.f32 %v374_v24, %v124_v12  ;;  %v333_v27 = vpop.f32.mrb[3].mxu0  ;;  %v376_v28 = vpop.f32.mrb[3].mxu1  ;;  %v379_v31 = vmax.f32 %v328_v17, 0.0  ;;  %v381_v32 = vmax.f32 %v371_v18, 0.0 }
 0x131   :  { %v334_v29 = vadd.f32 %v333_v27, %v120_v13  ;;  %v377_v30 = vadd.f32 %v376_v28, %v128_v14  ;;  %v380_v35 = vmax.f32 %v330_v21, 0.0  ;;  %v382_v36 = vmax.f32 %v373_v22, 0.0 }
 0x132   :  { %v383_v33 = vmax.f32 %v332_v25, 0.0  ;;  %v385_v34 = vmax.f32 %v375_v26, 0.0 }
 0x133   :  { %v384_v37 = vmax.f32 %v334_v29, 0.0  ;;  %v386_v38 = vmax.f32 %v377_v30, 0.0 }
 0x134   :  { %v389_v39 = vpack.c.bf16 %v383_v33, %v379_v31  ;;  %v391_v40 = vpack.c.bf16 %v385_v34, %v381_v32 }
 0x135   :  { %v390_v41 = vpack.c.bf16 %v384_v37, %v380_v35  ;;  %v392_v42 = vpack.c.bf16 %v386_v38, %v382_v36 }
 0x137   :  { %681 = vmatprep.mubr.bf16.mxu0 %v390_v41  ;;  %722 = vmatprep.mubr.bf16.mxu1 %v392_v42 }
 0x138   :  { %682 = vmatmul.mubr.bf16.vlgmr.msra.gmra.mrb[4].mxu0 %v389_v39  ;;  %723 = vmatmul.mubr.bf16.vlgmr.msra.gmra.mrb[4].mxu1 %v391_v40 }
 0x20b   :  { %v841_v43 = vpop.f32.mrb[4].mxu0  ;;  %v863_v44 = vpop.f32.mrb[4].mxu1 }
 0x20c   :  { %v842_v45 = vpop.f32.mrb[5].mxu0  ;;  %v864_v46 = vpop.f32.mrb[5].mxu1 }
 0x20d   :  { %v843_v47 = vadd.f32 %v842_v45, %v841_v43  ;;  %v865_v48 = vadd.f32 %v864_v46, %v863_v44  ;;  %v844_v49 = vpop.f32.mrb[6].mxu0  ;;  %v866_v50 = vpop.f32.mrb[6].mxu1 }
 0x20e   :  { %v845_v52 = vpop.f32.mrb[7].mxu0  ;;  %v867_v53 = vpop.f32.mrb[7].mxu1 }
 0x20f   :  { %v725_v54 = vadd.f32 %v865_v48, %v843_v47  ;;  %v846_v55 = vadd.f32 %v845_v52, %v844_v49  ;;  %v868_v56 = vadd.f32 %v867_v53, %v866_v50 }
 0x211   :  { %v731_v57 = vadd.f32 %v760_v51, %v725_v54  ;;  %v728_v58 = vadd.f32 %v868_v56, %v846_v55 }
 0x213   :  { %740 = vst [vmem:[#allocation9] sm:$0xff] %v731_v57  ;;  %v732_v59 = vadd.f32 %v760_v51, %v728_v58 }
 0x215   :  { %741 = vst [vmem:[#allocation9 + $0x8] sm:$0xff] %v732_v59 }
 0x216   :  { %1037 = shalt.err (!%p1034_p0)
}
 0x217   :  { %s1038_s14 = scalar_lea.hbm %s1160_s5, 256 }
 0x218   :  { %p1039_p1 = scmp.ne.s32.totalorder %s1160_s5, %s1038_s14  ;;  %p1042_p2 = scmp.lt.u32.totalorder %s1038_s14, %s1160_s5 }
 0x21a   :  { %p1044_p3 = pnand %p1042_p2, %p1039_p1 }
 0x21c   :  { %1047 = shalt.err (!%p1044_p3)
}
 0x21d   :  { %753 = dma.vmem_to_hbm [thread:$0]  %s748_s11, 256, %s1160_s5, [#allocation5], %s1058_s1, %s1058_s1, %s1059_s17  }
 0x21e   :  { %1052 = dma.done.wait [#allocation5], 256  }
 0x21f   :  { %1053 = vsyncadd [#allocation5], 4294967040 }
 0x220   :  { %757 = vsyncpa [#allocation4], 1 }
 0x221   :  { %758 = vsyncpa [#allocation7], 1 }
 0x222   :  { %759 = vsyncpa [#allocation5], 1 }

</bundles_post_ra>
